<compile_context>
chip_gen: v5e
topology: v5e:2x2
jax: 0.10.0
libtpu: 0.0.40
codegen_flags: <defaults>
</compile_context>

<pallas_src>
import functools

import jax
import jax.numpy as jnp
import numpy as np
from jax import lax
from jax.experimental import pallas as pl
from jax.experimental.pallas import tpu as pltpu


def basic_block_kernel(x_ref, a1_ref, s1_ref, b1_ref, a2_ref, s2_ref, b2_ref,
                       m_ref, o_ref, patch_ref, *, width):
    C = x_ref.shape[1]
    HW = x_ref.shape[2]

    x = x_ref[0]          # (C, HW)  conv1 input AND residual identity
    masks = m_ref[...]    # (9, HW)  per-tap boundary masks (1 = pixel in bounds)

    def conv3x3(v, a_ref):
        # im2col: 9 lane rotations of the flat image, boundary-masked, packed
        # into the (9*C, HW) scratch, then a single MXU matmul.
        for k in range(9):
            oy, ox = k // 3 - 1, k % 3 - 1
            if oy == 0 and ox == 0:
                tap = v                                   # centre tap, no shift
            else:
                # tap[p] = v[p + oy*width + ox]  (wrap-around is masked away)
                shift = (-(oy * width + ox)) % HW
                tap = pltpu.roll(v, shift, axis=1) * masks[k:k + 1, :]
            patch_ref[k * C:(k + 1) * C, :] = tap
        return jnp.dot(a_ref[...], patch_ref[...],
                       preferred_element_type=jnp.float32)

    # conv1 -> folded BN1 -> ReLU
    mid = jnp.maximum(conv3x3(x, a1_ref) * s1_ref[...] + b1_ref[...], 0.0)
    # conv2 -> folded BN2 -> +identity -> ReLU
    out = conv3x3(mid, a2_ref) * s2_ref[...] + b2_ref[...] + x
    o_ref[0] = jnp.maximum(out, 0.0)


def basic_block(x_nchw, w1_oihw, w2_oihw, scale1, bias1, scale2, bias2):
    """BasicBlock forward (eval-mode BN folded into scale/bias).

    x_nchw : (N, C, H, W) f32 (PyTorch layout).
    w*_oihw: (C, C, 3, 3) f32 (PyTorch conv weight layout).
    scale*/bias*: (C,) folded BN parameters.
    Returns (N, C, H, W) f32.
    """
    N, C, H, W = x_nchw.shape
    HW = H * W

    x_flat = x_nchw.reshape(N, C, HW)                       # free reshape

    # im2col weight matrices: A[co, (kh*3+kw)*Cin + ci] = w[co, ci, kh, kw]
    a1 = jnp.transpose(w1_oihw, (0, 2, 3, 1)).reshape(C, 9 * C)
    a2 = jnp.transpose(w2_oihw, (0, 2, 3, 1)).reshape(C, 9 * C)
    s1 = scale1.reshape(C, 1)
    b1 = bias1.reshape(C, 1)
    s2 = scale2.reshape(C, 1)
    b2 = bias2.reshape(C, 1)

    # Per-tap boundary masks (1 where the shifted pixel lies inside the image).
    yy, xx = np.meshgrid(np.arange(H), np.arange(W), indexing="ij")
    masks_np = np.zeros((9, HW), np.float32)
    for k in range(9):
        oy, ox = k // 3 - 1, k % 3 - 1
        valid = ((yy + oy >= 0) & (yy + oy < H) &
                 (xx + ox >= 0) & (xx + ox < W))
        masks_np[k] = valid.reshape(-1).astype(np.float32)
    masks = jnp.asarray(masks_np)

    out_flat = pl.pallas_call(
        functools.partial(basic_block_kernel, width=W),
        out_shape=jax.ShapeDtypeStruct((N, C, HW), jnp.float32),
        grid_spec=pltpu.PrefetchScalarGridSpec(
            num_scalar_prefetch=0,
            grid=(N,),
            in_specs=[
                pl.BlockSpec((1, C, HW), lambda n: (n, 0, 0)),   # x (flat NCHW)
                pl.BlockSpec((C, 9 * C), lambda n: (0, 0)),      # A1
                pl.BlockSpec((C, 1), lambda n: (0, 0)),          # scale1
                pl.BlockSpec((C, 1), lambda n: (0, 0)),          # bias1
                pl.BlockSpec((C, 9 * C), lambda n: (0, 0)),      # A2
                pl.BlockSpec((C, 1), lambda n: (0, 0)),          # scale2
                pl.BlockSpec((C, 1), lambda n: (0, 0)),          # bias2
                pl.BlockSpec((9, HW), lambda n: (0, 0)),         # tap masks
            ],
            out_specs=pl.BlockSpec((1, C, HW), lambda n: (n, 0, 0)),
            scratch_shapes=[pltpu.VMEM((9 * C, HW), jnp.float32)],  # im2col
        ),
        compiler_params=pltpu.CompilerParams(
            dimension_semantics=("parallel",)),
    )(x_flat, a1, s1, b1, a2, s2, b2, masks)

    return out_flat.reshape(N, C, H, W)


def reference_nchw(x, w1, w2, g1, be1, m1, v1, g2, be2, m2, v2, eps):
    dn = ("NCHW", "OIHW", "NCHW")

    def bn(t, g, be, m, v):
        inv = g / jnp.sqrt(v + eps)
        return t * inv[None, :, None, None] + (be - m * inv)[None, :, None, None]

    y = lax.conv_general_dilated(x, w1, (1, 1), "SAME", dimension_numbers=dn,
                                 precision=lax.Precision.HIGHEST)
    y = jnp.maximum(bn(y, g1, be1, m1, v1), 0.0)
    z = lax.conv_general_dilated(y, w2, (1, 1), "SAME", dimension_numbers=dn,
                                 precision=lax.Precision.HIGHEST)
    z = bn(z, g2, be2, m2, v2) + x
    return jnp.maximum(z, 0.0)


if __name__ == "__main__":
    # BasicBlock(inplanes=4, planes=4, stride=1, downsample=None)
    N, C, H, W = 2, 4, 16, 16
    eps = 1e-5

    key = jax.random.PRNGKey(0)
    (kx, kw1, kw2, kg1, kb1, kg2, kb2,
     km1, kv1, km2, kv2) = jax.random.split(key, 11)

    # Input / weights in PyTorch conventions (NCHW, OIHW).
    x_nchw = jax.random.normal(kx, (N, C, H, W), jnp.float32)
    w1_oihw = jax.random.normal(kw1, (C, C, 3, 3), jnp.float32) * 0.1
    w2_oihw = jax.random.normal(kw2, (C, C, 3, 3), jnp.float32) * 0.1

    # BatchNorm parameters (eval mode).
    g1 = 1.0 + 0.1 * jax.random.normal(kg1, (C,), jnp.float32)
    be1 = 0.1 * jax.random.normal(kb1, (C,), jnp.float32)
    m1 = 0.1 * jax.random.normal(km1, (C,), jnp.float32)
    v1 = 1.0 + 0.1 * jax.random.uniform(kv1, (C,), jnp.float32)
    g2 = 1.0 + 0.1 * jax.random.normal(kg2, (C,), jnp.float32)
    be2 = 0.1 * jax.random.normal(kb2, (C,), jnp.float32)
    m2 = 0.1 * jax.random.normal(km2, (C,), jnp.float32)
    v2 = 1.0 + 0.1 * jax.random.uniform(kv2, (C,), jnp.float32)

    # Fold running stats into per-channel scale / bias.
    inv1 = g1 / jnp.sqrt(v1 + eps)
    inv2 = g2 / jnp.sqrt(v2 + eps)
    s1, b1 = inv1, be1 - m1 * inv1
    s2, b2 = inv2, be2 - m2 * inv2

    out = basic_block(x_nchw, w1_oihw, w2_oihw, s1, b1, s2, b2)
    out = jax.block_until_ready(out)

    ref = reference_nchw(x_nchw, w1_oihw, w2_oihw,
                         g1, be1, m1, v1, g2, be2, m2, v2, eps)
    np.testing.assert_allclose(np.asarray(out), np.asarray(ref),
                               rtol=1e-4, atol=1e-4)
    assert out.shape == (N, C, H, W)
    print("KERNEL_OK")
</pallas_src>

<mosaic_0001>
module attributes {stable_mosaic.version = 11 : i64} {
  func.func @basic_block_kernel(%arg0: i32, %arg1: memref<1x4x256xf32, #tpu.memory_space<vmem>>, %arg2: memref<4x36xf32, #tpu.memory_space<vmem>>, %arg3: memref<4x1xf32, #tpu.memory_space<vmem>>, %arg4: memref<4x1xf32, #tpu.memory_space<vmem>>, %arg5: memref<4x36xf32, #tpu.memory_space<vmem>>, %arg6: memref<4x1xf32, #tpu.memory_space<vmem>>, %arg7: memref<4x1xf32, #tpu.memory_space<vmem>>, %arg8: memref<9x256xf32, #tpu.memory_space<vmem>>, %arg9: memref<1x4x256xf32, #tpu.memory_space<vmem>>, %arg10: memref<36x256xf32, #tpu.memory_space<vmem>>) attributes {dimension_semantics = [#tpu.dimension_semantics<parallel>], iteration_bounds = array<i64: 2>, scalar_prefetch = 0 : i64, scratch_operands = 1 : i64, tpu.core_type = #tpu.core_type<tc>, window_params = [{transform_indices = @transform_0, window_bounds = array<i64: 1, 4, 256>}, {pipeline_mode = #tpu.pipeline_mode<synchronous>, transform_indices = @transform_1, window_bounds = array<i64: 4, 36>}, {pipeline_mode = #tpu.pipeline_mode<synchronous>, transform_indices = @transform_2, window_bounds = array<i64: 4, 1>}, {pipeline_mode = #tpu.pipeline_mode<synchronous>, transform_indices = @transform_3, window_bounds = array<i64: 4, 1>}, {pipeline_mode = #tpu.pipeline_mode<synchronous>, transform_indices = @transform_4, window_bounds = array<i64: 4, 36>}, {pipeline_mode = #tpu.pipeline_mode<synchronous>, transform_indices = @transform_5, window_bounds = array<i64: 4, 1>}, {pipeline_mode = #tpu.pipeline_mode<synchronous>, transform_indices = @transform_6, window_bounds = array<i64: 4, 1>}, {pipeline_mode = #tpu.pipeline_mode<synchronous>, transform_indices = @transform_7, window_bounds = array<i64: 9, 256>}, {transform_indices = @transform_8, window_bounds = array<i64: 1, 4, 256>}]} {
    %c0 = arith.constant 0 : index
    %c0_0 = arith.constant 0 : index
    %c0_1 = arith.constant 0 : index
    %0 = vector.load %arg1[%c0, %c0_0, %c0_1] : memref<1x4x256xf32, #tpu.memory_space<vmem>>, vector<1x4x256xf32>
    %1 = vector.shape_cast %0 : vector<1x4x256xf32> to vector<4x256xf32>
    %c0_2 = arith.constant 0 : index
    %c0_3 = arith.constant 0 : index
    %2 = vector.load %arg8[%c0_2, %c0_3] : memref<9x256xf32, #tpu.memory_space<vmem>>, vector<9x256xf32>
    %c17_i32 = arith.constant 17 : i32
    %3 = tpu.dynamic_rotate %1 by %c17_i32 dim 1 : vector<4x256xf32>, i32 -> vector<4x256xf32>
    %4 = vector.extract_strided_slice %2 {offsets = [0, 0], sizes = [1, 256], strides = [1, 1]} : vector<9x256xf32> to vector<1x256xf32>
    %5 = vector.broadcast %4 : vector<1x256xf32> to vector<4x256xf32>
    %6 = arith.mulf %3, %5 : vector<4x256xf32>
    %c0_4 = arith.constant 0 : index
    %c0_5 = arith.constant 0 : index
    %7 = vector.load %arg10[%c0_4, %c0_5] : memref<36x256xf32, #tpu.memory_space<vmem>>, vector<4x256xf32>
    tpu.vector_store %arg10[%c0_4, %c0_5], %6 {strides = array<i32>} : memref<36x256xf32, #tpu.memory_space<vmem>>, vector<4x256xf32>,
    %c16_i32 = arith.constant 16 : i32
    %8 = tpu.dynamic_rotate %1 by %c16_i32 dim 1 : vector<4x256xf32>, i32 -> vector<4x256xf32>
    %9 = vector.extract_strided_slice %2 {offsets = [1, 0], sizes = [1, 256], strides = [1, 1]} : vector<9x256xf32> to vector<1x256xf32>
    %10 = vector.broadcast %9 : vector<1x256xf32> to vector<4x256xf32>
    %11 = arith.mulf %8, %10 : vector<4x256xf32>
    %c4 = arith.constant 4 : index
    %c0_6 = arith.constant 0 : index
    %12 = vector.load %arg10[%c4, %c0_6] : memref<36x256xf32, #tpu.memory_space<vmem>>, vector<4x256xf32>
    tpu.vector_store %arg10[%c4, %c0_6], %11 {strides = array<i32>} : memref<36x256xf32, #tpu.memory_space<vmem>>, vector<4x256xf32>,
    %c15_i32 = arith.constant 15 : i32
    %13 = tpu.dynamic_rotate %1 by %c15_i32 dim 1 : vector<4x256xf32>, i32 -> vector<4x256xf32>
    %14 = vector.extract_strided_slice %2 {offsets = [2, 0], sizes = [1, 256], strides = [1, 1]} : vector<9x256xf32> to vector<1x256xf32>
    %15 = vector.broadcast %14 : vector<1x256xf32> to vector<4x256xf32>
    %16 = arith.mulf %13, %15 : vector<4x256xf32>
    %c8 = arith.constant 8 : index
    %c0_7 = arith.constant 0 : index
    %17 = vector.load %arg10[%c8, %c0_7] : memref<36x256xf32, #tpu.memory_space<vmem>>, vector<4x256xf32>
    tpu.vector_store %arg10[%c8, %c0_7], %16 {strides = array<i32>} : memref<36x256xf32, #tpu.memory_space<vmem>>, vector<4x256xf32>,
    %c1_i32 = arith.constant 1 : i32
    %18 = tpu.dynamic_rotate %1 by %c1_i32 dim 1 : vector<4x256xf32>, i32 -> vector<4x256xf32>
    %19 = vector.extract_strided_slice %2 {offsets = [3, 0], sizes = [1, 256], strides = [1, 1]} : vector<9x256xf32> to vector<1x256xf32>
    %20 = vector.broadcast %19 : vector<1x256xf32> to vector<4x256xf32>
    %21 = arith.mulf %18, %20 : vector<4x256xf32>
    %c12 = arith.constant 12 : index
    %c0_8 = arith.constant 0 : index
    %22 = vector.load %arg10[%c12, %c0_8] : memref<36x256xf32, #tpu.memory_space<vmem>>, vector<4x256xf32>
    tpu.vector_store %arg10[%c12, %c0_8], %21 {strides = array<i32>} : memref<36x256xf32, #tpu.memory_space<vmem>>, vector<4x256xf32>,
    %c16 = arith.constant 16 : index
    %c0_9 = arith.constant 0 : index
    %23 = vector.load %arg10[%c16, %c0_9] : memref<36x256xf32, #tpu.memory_space<vmem>>, vector<4x256xf32>
    tpu.vector_store %arg10[%c16, %c0_9], %1 {strides = array<i32>} : memref<36x256xf32, #tpu.memory_space<vmem>>, vector<4x256xf32>,
    %c255_i32 = arith.constant 255 : i32
    %24 = tpu.dynamic_rotate %1 by %c255_i32 dim 1 : vector<4x256xf32>, i32 -> vector<4x256xf32>
    %25 = vector.extract_strided_slice %2 {offsets = [5, 0], sizes = [1, 256], strides = [1, 1]} : vector<9x256xf32> to vector<1x256xf32>
    %26 = vector.broadcast %25 : vector<1x256xf32> to vector<4x256xf32>
    %27 = arith.mulf %24, %26 : vector<4x256xf32>
    %c20 = arith.constant 20 : index
    %c0_10 = arith.constant 0 : index
    %28 = vector.load %arg10[%c20, %c0_10] : memref<36x256xf32, #tpu.memory_space<vmem>>, vector<4x256xf32>
    tpu.vector_store %arg10[%c20, %c0_10], %27 {strides = array<i32>} : memref<36x256xf32, #tpu.memory_space<vmem>>, vector<4x256xf32>,
    %c241_i32 = arith.constant 241 : i32
    %29 = tpu.dynamic_rotate %1 by %c241_i32 dim 1 : vector<4x256xf32>, i32 -> vector<4x256xf32>
    %30 = vector.extract_strided_slice %2 {offsets = [6, 0], sizes = [1, 256], strides = [1, 1]} : vector<9x256xf32> to vector<1x256xf32>
    %31 = vector.broadcast %30 : vector<1x256xf32> to vector<4x256xf32>
    %32 = arith.mulf %29, %31 : vector<4x256xf32>
    %c24 = arith.constant 24 : index
    %c0_11 = arith.constant 0 : index
    %33 = vector.load %arg10[%c24, %c0_11] : memref<36x256xf32, #tpu.memory_space<vmem>>, vector<4x256xf32>
    tpu.vector_store %arg10[%c24, %c0_11], %32 {strides = array<i32>} : memref<36x256xf32, #tpu.memory_space<vmem>>, vector<4x256xf32>,
    %c240_i32 = arith.constant 240 : i32
    %34 = tpu.dynamic_rotate %1 by %c240_i32 dim 1 : vector<4x256xf32>, i32 -> vector<4x256xf32>
    %35 = vector.extract_strided_slice %2 {offsets = [7, 0], sizes = [1, 256], strides = [1, 1]} : vector<9x256xf32> to vector<1x256xf32>
    %36 = vector.broadcast %35 : vector<1x256xf32> to vector<4x256xf32>
    %37 = arith.mulf %34, %36 : vector<4x256xf32>
    %c28 = arith.constant 28 : index
    %c0_12 = arith.constant 0 : index
    %38 = vector.load %arg10[%c28, %c0_12] : memref<36x256xf32, #tpu.memory_space<vmem>>, vector<4x256xf32>
    tpu.vector_store %arg10[%c28, %c0_12], %37 {strides = array<i32>} : memref<36x256xf32, #tpu.memory_space<vmem>>, vector<4x256xf32>,
    %c239_i32 = arith.constant 239 : i32
    %39 = tpu.dynamic_rotate %1 by %c239_i32 dim 1 : vector<4x256xf32>, i32 -> vector<4x256xf32>
    %40 = vector.extract_strided_slice %2 {offsets = [8, 0], sizes = [1, 256], strides = [1, 1]} : vector<9x256xf32> to vector<1x256xf32>
    %41 = vector.broadcast %40 : vector<1x256xf32> to vector<4x256xf32>
    %42 = arith.mulf %39, %41 : vector<4x256xf32>
    %c32 = arith.constant 32 : index
    %c0_13 = arith.constant 0 : index
    %43 = vector.load %arg10[%c32, %c0_13] : memref<36x256xf32, #tpu.memory_space<vmem>>, vector<4x256xf32>
    tpu.vector_store %arg10[%c32, %c0_13], %42 {strides = array<i32>} : memref<36x256xf32, #tpu.memory_space<vmem>>, vector<4x256xf32>,
    %c0_14 = arith.constant 0 : index
    %c0_15 = arith.constant 0 : index
    %44 = vector.load %arg2[%c0_14, %c0_15] : memref<4x36xf32, #tpu.memory_space<vmem>>, vector<4x36xf32>
    %c0_16 = arith.constant 0 : index
    %c0_17 = arith.constant 0 : index
    %45 = vector.load %arg10[%c0_16, %c0_17] : memref<36x256xf32, #tpu.memory_space<vmem>>, vector<36x256xf32>
    %cst = arith.constant dense<0.000000e+00> : vector<4x256xf32>
    %46 = tpu.matmul %44, %45, %cst {dimension_numbers = #tpu.dot_dimension_numbers<[1], [0], [0], [1], [0, 0, 1, 1], [], []>} : vector<4x36xf32>, vector<36x256xf32>, vector<4x256xf32> -> vector<4x256xf32>
    %c0_18 = arith.constant 0 : index
    %c0_19 = arith.constant 0 : index
    %47 = vector.load %arg3[%c0_18, %c0_19] : memref<4x1xf32, #tpu.memory_space<vmem>>, vector<4x1xf32>
    %48 = vector.broadcast %47 : vector<4x1xf32> to vector<4x256xf32>
    %49 = arith.mulf %46, %48 : vector<4x256xf32>
    %c0_20 = arith.constant 0 : index
    %c0_21 = arith.constant 0 : index
    %50 = vector.load %arg4[%c0_20, %c0_21] : memref<4x1xf32, #tpu.memory_space<vmem>>, vector<4x1xf32>
    %51 = vector.broadcast %50 : vector<4x1xf32> to vector<4x256xf32>
    %52 = arith.addf %49, %51 : vector<4x256xf32>
    %cst_22 = arith.constant 0.000000e+00 : f32
    %53 = vector.broadcast %cst_22 : f32 to vector<4x256xf32>
    %54 = arith.maximumf %52, %53 : vector<4x256xf32>
    %c17_i32_23 = arith.constant 17 : i32
    %55 = tpu.dynamic_rotate %54 by %c17_i32_23 dim 1 : vector<4x256xf32>, i32 -> vector<4x256xf32>
    %56 = vector.extract_strided_slice %2 {offsets = [0, 0], sizes = [1, 256], strides = [1, 1]} : vector<9x256xf32> to vector<1x256xf32>
    %57 = vector.broadcast %56 : vector<1x256xf32> to vector<4x256xf32>
    %58 = arith.mulf %55, %57 : vector<4x256xf32>
    %c0_24 = arith.constant 0 : index
    %c0_25 = arith.constant 0 : index
    %59 = vector.load %arg10[%c0_24, %c0_25] : memref<36x256xf32, #tpu.memory_space<vmem>>, vector<4x256xf32>
    tpu.vector_store %arg10[%c0_24, %c0_25], %58 {strides = array<i32>} : memref<36x256xf32, #tpu.memory_space<vmem>>, vector<4x256xf32>,
    %c16_i32_26 = arith.constant 16 : i32
    %60 = tpu.dynamic_rotate %54 by %c16_i32_26 dim 1 : vector<4x256xf32>, i32 -> vector<4x256xf32>
    %61 = vector.extract_strided_slice %2 {offsets = [1, 0], sizes = [1, 256], strides = [1, 1]} : vector<9x256xf32> to vector<1x256xf32>
    %62 = vector.broadcast %61 : vector<1x256xf32> to vector<4x256xf32>
    %63 = arith.mulf %60, %62 : vector<4x256xf32>
    %c4_27 = arith.constant 4 : index
    %c0_28 = arith.constant 0 : index
    %64 = vector.load %arg10[%c4_27, %c0_28] : memref<36x256xf32, #tpu.memory_space<vmem>>, vector<4x256xf32>
    tpu.vector_store %arg10[%c4_27, %c0_28], %63 {strides = array<i32>} : memref<36x256xf32, #tpu.memory_space<vmem>>, vector<4x256xf32>,
    %c15_i32_29 = arith.constant 15 : i32
    %65 = tpu.dynamic_rotate %54 by %c15_i32_29 dim 1 : vector<4x256xf32>, i32 -> vector<4x256xf32>
    %66 = vector.extract_strided_slice %2 {offsets = [2, 0], sizes = [1, 256], strides = [1, 1]} : vector<9x256xf32> to vector<1x256xf32>
    %67 = vector.broadcast %66 : vector<1x256xf32> to vector<4x256xf32>
    %68 = arith.mulf %65, %67 : vector<4x256xf32>
    %c8_30 = arith.constant 8 : index
    %c0_31 = arith.constant 0 : index
    %69 = vector.load %arg10[%c8_30, %c0_31] : memref<36x256xf32, #tpu.memory_space<vmem>>, vector<4x256xf32>
    tpu.vector_store %arg10[%c8_30, %c0_31], %68 {strides = array<i32>} : memref<36x256xf32, #tpu.memory_space<vmem>>, vector<4x256xf32>,
    %c1_i32_32 = arith.constant 1 : i32
    %70 = tpu.dynamic_rotate %54 by %c1_i32_32 dim 1 : vector<4x256xf32>, i32 -> vector<4x256xf32>
    %71 = vector.extract_strided_slice %2 {offsets = [3, 0], sizes = [1, 256], strides = [1, 1]} : vector<9x256xf32> to vector<1x256xf32>
    %72 = vector.broadcast %71 : vector<1x256xf32> to vector<4x256xf32>
    %73 = arith.mulf %70, %72 : vector<4x256xf32>
    %c12_33 = arith.constant 12 : index
    %c0_34 = arith.constant 0 : index
    %74 = vector.load %arg10[%c12_33, %c0_34] : memref<36x256xf32, #tpu.memory_space<vmem>>, vector<4x256xf32>
    tpu.vector_store %arg10[%c12_33, %c0_34], %73 {strides = array<i32>} : memref<36x256xf32, #tpu.memory_space<vmem>>, vector<4x256xf32>,
    %c16_35 = arith.constant 16 : index
    %c0_36 = arith.constant 0 : index
    %75 = vector.load %arg10[%c16_35, %c0_36] : memref<36x256xf32, #tpu.memory_space<vmem>>, vector<4x256xf32>
    tpu.vector_store %arg10[%c16_35, %c0_36], %54 {strides = array<i32>} : memref<36x256xf32, #tpu.memory_space<vmem>>, vector<4x256xf32>,
    %c255_i32_37 = arith.constant 255 : i32
    %76 = tpu.dynamic_rotate %54 by %c255_i32_37 dim 1 : vector<4x256xf32>, i32 -> vector<4x256xf32>
    %77 = vector.extract_strided_slice %2 {offsets = [5, 0], sizes = [1, 256], strides = [1, 1]} : vector<9x256xf32> to vector<1x256xf32>
    %78 = vector.broadcast %77 : vector<1x256xf32> to vector<4x256xf32>
    %79 = arith.mulf %76, %78 : vector<4x256xf32>
    %c20_38 = arith.constant 20 : index
    %c0_39 = arith.constant 0 : index
    %80 = vector.load %arg10[%c20_38, %c0_39] : memref<36x256xf32, #tpu.memory_space<vmem>>, vector<4x256xf32>
    tpu.vector_store %arg10[%c20_38, %c0_39], %79 {strides = array<i32>} : memref<36x256xf32, #tpu.memory_space<vmem>>, vector<4x256xf32>,
    %c241_i32_40 = arith.constant 241 : i32
    %81 = tpu.dynamic_rotate %54 by %c241_i32_40 dim 1 : vector<4x256xf32>, i32 -> vector<4x256xf32>
    %82 = vector.extract_strided_slice %2 {offsets = [6, 0], sizes = [1, 256], strides = [1, 1]} : vector<9x256xf32> to vector<1x256xf32>
    %83 = vector.broadcast %82 : vector<1x256xf32> to vector<4x256xf32>
    %84 = arith.mulf %81, %83 : vector<4x256xf32>
    %c24_41 = arith.constant 24 : index
    %c0_42 = arith.constant 0 : index
    %85 = vector.load %arg10[%c24_41, %c0_42] : memref<36x256xf32, #tpu.memory_space<vmem>>, vector<4x256xf32>
    tpu.vector_store %arg10[%c24_41, %c0_42], %84 {strides = array<i32>} : memref<36x256xf32, #tpu.memory_space<vmem>>, vector<4x256xf32>,
    %c240_i32_43 = arith.constant 240 : i32
    %86 = tpu.dynamic_rotate %54 by %c240_i32_43 dim 1 : vector<4x256xf32>, i32 -> vector<4x256xf32>
    %87 = vector.extract_strided_slice %2 {offsets = [7, 0], sizes = [1, 256], strides = [1, 1]} : vector<9x256xf32> to vector<1x256xf32>
    %88 = vector.broadcast %87 : vector<1x256xf32> to vector<4x256xf32>
    %89 = arith.mulf %86, %88 : vector<4x256xf32>
    %c28_44 = arith.constant 28 : index
    %c0_45 = arith.constant 0 : index
    %90 = vector.load %arg10[%c28_44, %c0_45] : memref<36x256xf32, #tpu.memory_space<vmem>>, vector<4x256xf32>
    tpu.vector_store %arg10[%c28_44, %c0_45], %89 {strides = array<i32>} : memref<36x256xf32, #tpu.memory_space<vmem>>, vector<4x256xf32>,
    %c239_i32_46 = arith.constant 239 : i32
    %91 = tpu.dynamic_rotate %54 by %c239_i32_46 dim 1 : vector<4x256xf32>, i32 -> vector<4x256xf32>
    %92 = vector.extract_strided_slice %2 {offsets = [8, 0], sizes = [1, 256], strides = [1, 1]} : vector<9x256xf32> to vector<1x256xf32>
    %93 = vector.broadcast %92 : vector<1x256xf32> to vector<4x256xf32>
    %94 = arith.mulf %91, %93 : vector<4x256xf32>
    %c32_47 = arith.constant 32 : index
    %c0_48 = arith.constant 0 : index
    %95 = vector.load %arg10[%c32_47, %c0_48] : memref<36x256xf32, #tpu.memory_space<vmem>>, vector<4x256xf32>
    tpu.vector_store %arg10[%c32_47, %c0_48], %94 {strides = array<i32>} : memref<36x256xf32, #tpu.memory_space<vmem>>, vector<4x256xf32>,
    %c0_49 = arith.constant 0 : index
    %c0_50 = arith.constant 0 : index
    %96 = vector.load %arg5[%c0_49, %c0_50] : memref<4x36xf32, #tpu.memory_space<vmem>>, vector<4x36xf32>
    %c0_51 = arith.constant 0 : index
    %c0_52 = arith.constant 0 : index
    %97 = vector.load %arg10[%c0_51, %c0_52] : memref<36x256xf32, #tpu.memory_space<vmem>>, vector<36x256xf32>
    %cst_53 = arith.constant dense<0.000000e+00> : vector<4x256xf32>
    %98 = tpu.matmul %96, %97, %cst_53 {dimension_numbers = #tpu.dot_dimension_numbers<[1], [0], [0], [1], [0, 0, 1, 1], [], []>} : vector<4x36xf32>, vector<36x256xf32>, vector<4x256xf32> -> vector<4x256xf32>
    %c0_54 = arith.constant 0 : index
    %c0_55 = arith.constant 0 : index
    %99 = vector.load %arg6[%c0_54, %c0_55] : memref<4x1xf32, #tpu.memory_space<vmem>>, vector<4x1xf32>
    %100 = vector.broadcast %99 : vector<4x1xf32> to vector<4x256xf32>
    %101 = arith.mulf %98, %100 : vector<4x256xf32>
    %c0_56 = arith.constant 0 : index
    %c0_57 = arith.constant 0 : index
    %102 = vector.load %arg7[%c0_56, %c0_57] : memref<4x1xf32, #tpu.memory_space<vmem>>, vector<4x1xf32>
    %103 = vector.broadcast %102 : vector<4x1xf32> to vector<4x256xf32>
    %104 = arith.addf %101, %103 : vector<4x256xf32>
    %105 = arith.addf %104, %1 : vector<4x256xf32>
    %cst_58 = arith.constant 0.000000e+00 : f32
    %106 = vector.broadcast %cst_58 : f32 to vector<4x256xf32>
    %107 = arith.maximumf %105, %106 : vector<4x256xf32>
    %c0_59 = arith.constant 0 : index
    %c0_60 = arith.constant 0 : index
    %c0_61 = arith.constant 0 : index
    %108 = vector.load %arg9[%c0_59, %c0_60, %c0_61] : memref<1x4x256xf32, #tpu.memory_space<vmem>>, vector<1x4x256xf32>
    %109 = vector.shape_cast %108 : vector<1x4x256xf32> to vector<4x256xf32>
    %110 = vector.shape_cast %107 : vector<4x256xf32> to vector<1x4x256xf32>
    tpu.vector_store %arg9[%c0_59, %c0_60, %c0_61], %110 {strides = array<i32>} : memref<1x4x256xf32, #tpu.memory_space<vmem>>, vector<1x4x256xf32>,
    return
  }
  func.func @transform_0(%arg0: i32) -> (i32, i32, i32) {
    %c0_i32 = arith.constant 0 : i32
    %c0_i32_0 = arith.constant 0 : i32
    %c0_i32_1 = arith.constant 0 : i32
    return %arg0, %c0_i32, %c0_i32_0 : i32, i32, i32
  }
  func.func @transform_1(%arg0: i32) -> (i32, i32) {
    %c0_i32 = arith.constant 0 : i32
    %c0_i32_0 = arith.constant 0 : i32
    %c0_i32_1 = arith.constant 0 : i32
    return %c0_i32, %c0_i32_0 : i32, i32
  }
  func.func @transform_2(%arg0: i32) -> (i32, i32) {
    %c0_i32 = arith.constant 0 : i32
    %c0_i32_0 = arith.constant 0 : i32
    %c0_i32_1 = arith.constant 0 : i32
    return %c0_i32, %c0_i32_0 : i32, i32
  }
  func.func @transform_3(%arg0: i32) -> (i32, i32) {
    %c0_i32 = arith.constant 0 : i32
    %c0_i32_0 = arith.constant 0 : i32
    %c0_i32_1 = arith.constant 0 : i32
    return %c0_i32, %c0_i32_0 : i32, i32
  }
  func.func @transform_4(%arg0: i32) -> (i32, i32) {
    %c0_i32 = arith.constant 0 : i32
    %c0_i32_0 = arith.constant 0 : i32
    %c0_i32_1 = arith.constant 0 : i32
    return %c0_i32, %c0_i32_0 : i32, i32
  }
  func.func @transform_5(%arg0: i32) -> (i32, i32) {
    %c0_i32 = arith.constant 0 : i32
    %c0_i32_0 = arith.constant 0 : i32
    %c0_i32_1 = arith.constant 0 : i32
    return %c0_i32, %c0_i32_0 : i32, i32
  }
  func.func @transform_6(%arg0: i32) -> (i32, i32) {
    %c0_i32 = arith.constant 0 : i32
    %c0_i32_0 = arith.constant 0 : i32
    %c0_i32_1 = arith.constant 0 : i32
    return %c0_i32, %c0_i32_0 : i32, i32
  }
  func.func @transform_7(%arg0: i32) -> (i32, i32) {
    %c0_i32 = arith.constant 0 : i32
    %c0_i32_0 = arith.constant 0 : i32
    %c0_i32_1 = arith.constant 0 : i32
    return %c0_i32, %c0_i32_0 : i32, i32
  }
  func.func @transform_8(%arg0: i32) -> (i32, i32, i32) {
    %c0_i32 = arith.constant 0 : i32
    %c0_i32_0 = arith.constant 0 : i32
    %c0_i32_1 = arith.constant 0 : i32
    return %arg0, %c0_i32, %c0_i32_0 : i32, i32, i32
  }
}

</mosaic_0001>

<bundles_post_ra>
// kernel: tpu_custom_call.1
= control target key start
LH: loop header
LB: loop body
LE: loop exit
PB: predicated region body
PF: predicated region fallthrough
CT: control target
= control target key end

     0   :  { %s1545_s0 = inlined_call_operand.hbm [shape: f32[2,4,256], index: 0, kind: input, shape index: {}]   ;;  %s1546_s1 = inlined_call_operand.vmem [shape: f32[4,36], index: 1, kind: input, shape index: {}]   ;;  %s1547_s2 = inlined_call_operand.vmem [shape: f32[4,1], index: 2, kind: input, shape index: {}]   ;;  %s1548_s3 = inlined_call_operand.vmem [shape: f32[4,1], index: 3, kind: input, shape index: {}]   ;;  %s1549_s4 = inlined_call_operand.vmem [shape: f32[4,36], index: 4, kind: input, shape index: {}]   ;;  %s1550_s5 = inlined_call_operand.vmem [shape: f32[4,1], index: 5, kind: input, shape index: {}]   ;;  %s1551_s6 = inlined_call_operand.vmem [shape: f32[4,1], index: 6, kind: input, shape index: {}]   ;;  %s1552_s7 = inlined_call_operand.hbm [shape: f32[9,256], index: 7, kind: input, shape index: {}]   ;;  %s1553_s8 = inlined_call_operand.hbm [shape: f32[2,4,256], index: 8, kind: output, shape index: {}]  }
   0x1   :  { %1554 = sst [smem:[#allocation13_spill]] %s1552_s7 }
   0x2   :  { %13 = vsyncpa [#allocation4], 0 }
   0x3   :  { %15 = vsyncpa [#allocation4 + $0x1], 0 }
   0x4   :  { %16 = vsyncpa [#allocation7], 0 }
   0x5   :  { %17 = vsyncpa [#allocation5], 0 }
   0x6   :  { %19 = vsyncpa [#allocation5 + $0x1], 0  ;;  %s1186_s27 = smov 0   ;;  %s1188_s28 = smov 0  }
   0x7   :  { %s1190_s29 = smov 0   ;;  %s1192_s30 = smov 0  }
   0x8 LB: > { %s1555_s7 = sld [smem:[#allocation13_spill]]  ;;  %s1210_s12 = sadd.s32 4294967295, %s1127_s30   ;;  %s1127_s30 = sphi %s1192_s30, %s1567_s30   ;;  %s1123_s29 = sphi %s1190_s29, %s1566_s29   ;;  %s1119_s28 = sphi %s1188_s28, %s1565_s28   ;;  %s1115_s27 = sphi %s1186_s27, %s1564_s27  }
   0x9   : > { %p899_p0 = scmp.ge.s32.totalorder %s1127_s30, 1  ;;  %p46_p1 = scmp.eq.s32.totalorder %s1210_s12, 0 }
   0xa   : > { %p229_p2 = scmp.lt.s32.totalorder %s1127_s30, 3  ;;  %s1129_s14 = smov [#allocation6]  }
   0xb   : > { %s260_s15 = sshll.u32 %s1129_s14, 4  ;;  %s1130_s16 = smov 256   ;;  %s261_s15 = int_to_ptr.vmem [resolvable:$true] %s260_s15 }
   0xc   : > { %p1215_p3 = pnand %p899_p0, %p229_p2  ;;  %s1131_s17 = smov 16  }
   0xd   : > { %s898_s18 = sadd.s32 4294967294, %s1127_s30   ;;  %s1226_s19 = sadd.s32 1, %s1127_s30  }
   0xe   : > { %s258_s11 = sshll.u32 %s1555_s7, 4  ;;  %p932_p4 = pneg %p1215_p3  ;;  %s259_s11 = int_to_ptr.hbm [resolvable:$true] %s258_s11 }
   0xf   : > { %s32_s20 = sadd.s32 1, %s1123_s29  ;;  %s29_s21 = ssub.s32 %s1127_s30, %s1226_s19 }
  0x10   : > { %p933_p6 = pnand %p932_p4, %p46_p1  ;;  %p39_p7 = scmp.ne.s32.totalorder %s1123_s29, %s1119_s28 }
  0x11   : > { %p30_p8 = scmp.eq.s32.totalorder %s29_s21, 0  ;;  %p40_p9 = scmp.eq.s32.totalorder %s1127_s30, 0 }
  0x12   : > { %935 = dma.hbm_to_vmem [thread:$0]  (!%p933_p6), %s259_s11, 512, %s261_s15, [#allocation7], %s1130_s16, %s1130_s16, %s1131_s17  }
  0x13   : > { %p45_p10 = scmp.ne.s32.totalorder %s1119_s28, %s1115_s27  ;;  %p216_p11 = scmp.eq.s32.totalorder %s1210_s12, 1 }
  0x14   : > { %s1238_s22 = scalar_select %p30_p8, %s1123_s29, %s32_s20  }
  0x15   : > { %p1242_p12 = por %p46_p1, %p45_p10  ;;  %p1246_p13 = por %p216_p11, %p39_p7 }
  0x16   : > { %1557 = sst [smem:[#allocation12_spill]] %s1238_s22  ;;  %p222_p0 = scmp.eq.s32.totalorder %s898_s18, 1 }
  0x17   : > { %p41_p2 = por %p40_p9, %p39_p7  ;;  %s274_s25 = sand.u32 1, %s1123_s29  }
  0x18   : > { %p1251_p4 = por %p222_p0, %p45_p10  ;;  %p945_p6 = scmp.lt.s32.totalorder %s1127_s30, 2 }
  0x19   : > { %s902_s9 = sshll.u32 %s274_s25, 3  ;;  %s922_s10 = sshll.u32 %s1127_s30, 3 }
  0x1a   : > { %s283_s15 = scalar_lea.hbm %s1545_s0, %s922_s10  ;;  %s278_s17 = scalar_lea.vmem [#allocation3], %s902_s9 }
  0x1b   : > { %s285_s16 = sshll.u32 %s283_s15, 4  ;;  %s287_s20 = sshll.u32 %s278_s17, 4  ;;  %s286_s16 = int_to_ptr.hbm [resolvable:$true] %s285_s16  ;;  %s288_s20 = int_to_ptr.vmem [resolvable:$true] %s287_s20 }
  0x1c   : > { %p1260_p8 = pnand %p945_p6, %p41_p2  ;;  %s275_s21 = scalar_lea.sflag [#allocation4], %s274_s25 }
  0x1d   : > { %s1027_s7 = sshra.s32 %s286_s16, 4  ;;  %s1034_s9 = scalar_lea.hbm %s1545_s0, 16  ;;  %s1028_s7 = int_to_ptr.hbm [resolvable:$true] %s1027_s7 }
  0x1e   : > { %s1029_s22 = scalar_lea.hbm %s1028_s7, 8  ;;  %p1031_p9 = pneg %p1260_p8 }
  0x1f   : > { %p1030_p7 = scmp.ne.s32.totalorder %s1028_s7, %s1029_s22  ;;  %p1035_p0 = scmp.lt.s32.totalorder %s1028_s7, %s1545_s0 }
  0x20   : > { %p1036_p2 = scmp.lt.s32.totalorder %s1034_s9, %s1029_s22 }
  0x21   : > { %p1032_p10 = pnand %p1031_p9, %p1030_p7 }
  0x22   : > { %p1037_p6 = por %p1036_p2, %p1035_p0 }
  0x23   : > { %p1033_p11 = pneg %p1032_p10 }
  0x25   : > { %p1038_p5 = pnand %p1037_p6, %p1033_p11 }
  0x27   : > { %1041 = shalt.err (!%p1038_p5)
}
  0x28   : > { %939 = dma.hbm_to_vmem [thread:$0]  (!%p1260_p8), %s286_s16, 128, %s288_s20, %s275_s21  }
  0x29   : > { %296 = sbr.rel (%p1215_p3) target bundleno = 713 (0x2c9), region = 52  ;;  %s1277_s25 = sand.u32 (!%p1215_p3), 1, %s1119_s28  }
  0x2a   : > { %s906_s17 = sshll.u32 (!%p1215_p3), %s1277_s25, 3  ;;  %s299_s10 = scalar_lea.sflag (!%p1215_p3), [#allocation4], %s1277_s25 }
  0x2b   : > { %s302_s7 = scalar_lea.vmem (!%p1215_p3), [#allocation3], %s906_s17 }
  0x2e   : > { %1102 = dma.done.wait (%p1242_p12), %s299_s10, 128  }
  0x2f   : > { %1104 = vsyncadd (%p1242_p12), %s299_s10, 4294967168 }
  0x30   : > { %1106 = dma.done.wait (%p46_p1), [#allocation7], 512  }
  0x31   : > { %1108 = vsyncadd (%p46_p1), [#allocation7], 4294966784  ;;  %v341_v0 = vld [vmem:[%s302_s7] sm:$0xff]  ;;  %s1132_s13 = smov 16   ;;  %s1133_s22 = smov 15   ;;  %v356_v20 = vlaneseq  ;;  %v1309_v22 = vld [vmem:[#allocation6] sm:$0xff] }
  0x32   : > { %347 = vst [vmem:[#allocation1] ss:$2 sm:$0xff] %v341_v0  ;;  %s1134_s23 = smov 1   ;;  %s1135_s16 = smov 127   ;;  %v1311_v23 = vld [vmem:[#allocation6 + $0x8] sm:$0xff]  ;;  %v379_v24 = vperm.slane %v1309_v22, 1 }
  0x33   : > { %s1136_s20 = smov 113   ;;  %s1137_s18 = smov 112   ;;  %v1307_v21 = vand.u32 127, %v356_v20  ;;  %v380_v25 = vperm.slane %v1311_v23, 1  ;;  %v421_v36 = vperm.slane %v1309_v22, 3  ;;  %v422_v37 = vperm.slane %v1311_v23, 3 }
  0x34   : > { %s1138_s21 = smov 17   ;;  %s1139_s11 = smov 111   ;;  %v452_v39 = vperm.slane %v1309_v22, 5  ;;  %v453_v40 = vperm.slane %v1311_v23, 5  ;;  %v476_v54 = vperm.slane %v1309_v22, 6  ;;  %v477_v55 = vperm.slane %v1311_v23, 6 }
  0x35   : > { %vm376_vm0 = vcmp.lt.s32.totalorder %v1307_v21, 16  ;;  %vm418_vm1 = vcmp.lt.s32.totalorder %v1307_v21, 1  ;;  %vm449_vm2 = vcmp.lt.s32.totalorder %v1307_v21, 127  ;;  %vm473_vm3 = vcmp.lt.s32.totalorder %v1307_v21, 113  ;;  %s340_s10 = scalar_lea.vmem [#allocation8], %s906_s17  ;;  %s1077_s17 = scalar_lea.hbm %s1553_s8, 16 }
  0x36   : > { %vm491_vm4 = vcmp.lt.s32.totalorder %v1307_v21, 112  ;;  %v494_v63 = vperm.slane %v1309_v22, 7  ;;  %vm358_vm5 = vcmp.lt.s32.totalorder %v1307_v21, 17  ;;  %vm515_vm6 = vcmp.lt.s32.totalorder %v1307_v21, 111  ;;  %s815_s7 = sshll.u32 %s340_s10, 4  ;;  %s816_s7 = int_to_ptr.vmem [resolvable:$true] %s815_s7 }
  0x37   : > { %vm400_vm7 = vcmp.lt.s32.totalorder %v1307_v21, 15  ;;  %vm539_vm8 = vcmask 1043456   ;;  %vm535_vm9 = vcmask 293888  }
  0x39   : > { %v348_v1 = vld.sshfl [vmem:[#allocation1] sm:$0xff pattern:$0x75316420]  ;;  %v349_v2 = vld.sshfl [vmem:[#allocation1 + $0x8] sm:$0xff pattern:$0x75316420] }
  0x3a   : > { %367 = vst [vmem:[#allocation1] ss:$2 sm:$0xff] %v341_v0 }
  0x41   : > { %v368_v3 = vld.sshfl [vmem:[#allocation1] sm:$0xff pattern:$0x75316420]  ;;  %v369_v4 = vld.sshfl [vmem:[#allocation1 + $0x8] sm:$0xff pattern:$0x75316420] }
  0x42   : > { %391 = vst [vmem:[#allocation1] ss:$2 sm:$0xff] %v341_v0  ;;  %372 = vrot.lane.b32.xlu1 %v368_v3, %s1132_s13  ;;  %374 = vrot.lane.b32.xlu2 %v369_v4, %s1132_s13  ;;  %v586_v3 = vld [vmem:[%s1547_s2] sm:$0xf] }
  0x43   : > { %v594_v4 = vld [vmem:[%s1548_s3] sm:$0xf] }
  0x49   : > { %v392_v5 = vld.sshfl [vmem:[#allocation1] sm:$0xff pattern:$0x75316420]  ;;  %v393_v6 = vld.sshfl [vmem:[#allocation1 + $0x8] sm:$0xff pattern:$0x75316420] }
  0x4a   : > { %396 = vrot.lane.b32.xlu0 %v392_v5, %s1133_s22  ;;  %409 = vst [vmem:[#allocation1] ss:$2 sm:$0xff] %v341_v0 }
  0x51   : > { %v410_v7 = vld.sshfl [vmem:[#allocation1] sm:$0xff pattern:$0x75316420]  ;;  %v411_v8 = vld.sshfl [vmem:[#allocation1 + $0x8] sm:$0xff pattern:$0x75316420] }
  0x52   : > { %416 = vrot.lane.b32.xlu0 %v411_v8, %s1134_s23  ;;  %433 = vst [vmem:[#allocation1] ss:$2 sm:$0xff] %v341_v0  ;;  %414 = vrot.lane.b32.xlu2 %v410_v7, %s1134_s23  ;;  %v1140_v7 = vmov 0  }
  0x53   : > { %992 = vset.pattern.permute.xlu1 %v1140_v7  ;;  %993 = vset.pattern.permute.xlu2 %v1140_v7 }
  0x54   : > { %994 = vset.pattern.permute.xlu0 %v1140_v7 }
  0x59   : > { %v434_v9 = vld.sshfl [vmem:[#allocation1] sm:$0xff pattern:$0x75316420]  ;;  %v435_v10 = vld.sshfl [vmem:[#allocation1 + $0x8] sm:$0xff pattern:$0x75316420] }
  0x5a   : > { %440 = vst [vmem:[#allocation1] ss:$2 sm:$0xff] %v341_v0 }
  0x5b   : > { %438 = vst [vmem:[#allocation2 + $0x48] sm:$0xf] %v434_v9 }
  0x5c   : > { %439 = vst [vmem:[#allocation2 + $0x28] sm:$0xf] %v435_v10 }
  0x61   : > { %v441_v11 = vld.sshfl [vmem:[#allocation1] sm:$0xff pattern:$0x75316420]  ;;  %v442_v12 = vld.sshfl [vmem:[#allocation1 + $0x8] sm:$0xff pattern:$0x75316420] }
  0x62   : > { %464 = vst [vmem:[#allocation1] ss:$2 sm:$0xff] %v341_v0  ;;  %445 = vrot.lane.b32.xlu2 %v441_v11, %s1135_s16 }
  0x69   : > { %v465_v13 = vld.sshfl [vmem:[#allocation1] sm:$0xff pattern:$0x75316420]  ;;  %v466_v14 = vld.sshfl [vmem:[#allocation1 + $0x8] sm:$0xff pattern:$0x75316420] }
  0x6a   : > { %469 = vrot.lane.b32.xlu0 %v465_v13, %s1136_s20  ;;  %471 = vrot.lane.b32.xlu1 %v466_v14, %s1136_s20  ;;  %482 = vst [vmem:[#allocation1] ss:$2 sm:$0xff] %v341_v0  ;;  %v362_v14 = vperm.slane %v1311_v23, 0 }
  0x6b   : > { %447 = vrot.lane.b32.xlu2 %v442_v12, %s1135_s16  ;;  %v361_v12 = vperm.slane %v1309_v22, 0 }
  0x71   : > { %v483_v15 = vld.sshfl [vmem:[#allocation1] sm:$0xff pattern:$0x75316420]  ;;  %v484_v16 = vld.sshfl [vmem:[#allocation1 + $0x8] sm:$0xff pattern:$0x75316420] }
  0x72   : > { %487 = vrot.lane.b32.xlu0 %v483_v15, %s1137_s18  ;;  %506 = vst [vmem:[#allocation1] ss:$2 sm:$0xff] %v341_v0  ;;  %v1380_v15 = vld [vmem:[#allocation6 + $0x10] ss:$0 sm:$0xff] }
  0x73   : > { %352 = vrot.lane.b32.xlu2 %v348_v1, %s1138_s21 }
  0x79   : > { %v507_v17 = vld.sshfl [vmem:[#allocation1] sm:$0xff pattern:$0x75316420]  ;;  %v508_v18 = vld.sshfl [vmem:[#allocation1 + $0x8] sm:$0xff pattern:$0x75316420] }
  0x7a   : > { %489 = vrot.lane.b32.xlu0 %v484_v16, %s1137_s18  ;;  %511 = vrot.lane.b32.xlu1 %v507_v17, %s1139_s11  ;;  %786 = vst [vmem:[#allocation1] ss:$2 sm:$0xff] %v341_v0  ;;  %v495_v0 = vperm.slane %v1311_v23, 7  ;;  %v1382_v16 = vld [vmem:[#allocation6 + $0x18] ss:$0 sm:$0xff] }
  0x7b   : > { %597 = vperm.xlu2 %993, %v594_v4   ;;  %v778_v4 = vld [vmem:[%s1551_s6] sm:$0xf] }
  0x82   : > { %354 = vrot.lane.b32.xlu0 %v349_v2, %s1138_s21  ;;  %513 = vrot.lane.b32.xlu1 %v508_v18, %s1139_s11 }
  0x8a   : > { %398 = vrot.lane.b32.xlu1 %v393_v6, %s1133_s22 }
  0x92   : > { %589 = vperm.xlu1 %992, %v586_v3  }
  0x9c   : > { %v375_v19 = vpop.permute.xlu2 %374 }
  0xac   : > { %v415_v26 = vpop.permute.xlu2 %414 }
  0xb4   : > { %v373_v27 = vpop.permute.xlu1 %372 }
  0xb5   : > { %v377_v28 = vsel %vm376_vm0, %v373_v27, %v375_v19  ;;  %v378_v29 = vsel %vm376_vm0, %v375_v19, %v373_v27 }
  0xb6   : > { %v381_v30 = vmul.f32 %v379_v24, %v378_v29  ;;  %v382_v31 = vmul.f32 %v380_v25, %v377_v28 }
  0xb8   : > { %v385_v32 = vrot.slane %v381_v30, 4  ;;  %v386_v33 = vrot.slane %v382_v31, 4 }
  0xba   : > { %389 = vst [vmem:[#allocation2 + $0x30] sm:$0xf0] %v385_v32  ;;  %v403_v32 = vperm.slane %v1309_v22, 2 }
  0xbb   : > { %390 = vst [vmem:[#allocation2] sm:$0xf0] %v386_v33  ;;  %v404_v33 = vperm.slane %v1311_v23, 2 }
  0xbc   : > { %v1324_v34 = vpop.permute.xlu0 %396  ;;  %v446_v35 = vpop.permute.xlu2 %445 }
  0xc4   : > { %v417_v38 = vpop.permute.xlu0 %416 }
  0xc5   : > { %v419_v41 = vsel %vm418_vm1, %v415_v26, %v417_v38  ;;  %v420_v42 = vsel %vm418_vm1, %v417_v38, %v415_v26  ;;  %v448_v43 = vpop.permute.xlu2 %447 }
  0xc6   : > { %v423_v44 = vmul.f32 %v421_v36, %v420_v42  ;;  %v424_v45 = vmul.f32 %v422_v37, %v419_v41  ;;  %v450_v46 = vsel %vm449_vm2, %v446_v35, %v448_v43  ;;  %v451_v47 = vsel %vm449_vm2, %v448_v43, %v446_v35 }
  0xc7   : > { %v454_v48 = vmul.f32 %v452_v39, %v450_v46  ;;  %v455_v49 = vmul.f32 %v453_v40, %v451_v47 }
  0xc8   : > { %v427_v50 = vrot.slane %v423_v44, 4  ;;  %v428_v51 = vrot.slane %v424_v45, 4 }
  0xc9   : > { %v458_v52 = vrot.slane %v454_v48, 4  ;;  %v459_v53 = vrot.slane %v455_v49, 4 }
  0xca   : > { %431 = vst [vmem:[#allocation2 + $0x18] sm:$0xf0] %v427_v50 }
  0xcb   : > { %432 = vst [vmem:[#allocation2 + $0x10] sm:$0xf0] %v428_v51  ;;  %v524_v51 = vld [vmem:[%s1546_s1] sm:$0xf] }
  0xcc   : > { %462 = vst [vmem:[#allocation2 + $0x48] sm:$0xf0] %v458_v52 }
  0xcd   : > { %463 = vst [vmem:[#allocation2 + $0x28] sm:$0xf0] %v459_v53  ;;  %v353_v13 = vpop.permute.xlu2 %352 }
  0xd4   : > { %v530_v48 = vld [vmem:[#allocation2 + $0x28] sm:$0xff] }
  0xdc   : > { %v470_v56 = vpop.permute.xlu0 %469  ;;  %v472_v57 = vpop.permute.xlu1 %471 }
  0xdd   : > { %v474_v58 = vsel %vm473_vm3, %v470_v56, %v472_v57  ;;  %v475_v59 = vsel %vm473_vm3, %v472_v57, %v470_v56 }
  0xde   : > { %v478_v60 = vmul.f32 %v476_v54, %v474_v58  ;;  %v479_v61 = vmul.f32 %v477_v55, %v475_v59  ;;  %v598_v58 = vpop.permute.xlu2 %597 }
  0xe0   : > { %480 = vst [vmem:[#allocation2 + $0x8] sm:$0xf] %v478_v60 }
  0xe1   : > { %481 = vst [vmem:[#allocation2 + $0x20] sm:$0xf] %v479_v61 }
  0xe4   : > { %v488_v62 = vpop.permute.xlu0 %487 }
  0xec   : > { %v490_v1 = vpop.permute.xlu0 %489  ;;  %v512_v2 = vpop.permute.xlu1 %511 }
  0xed   : > { %v492_v5 = vsel %vm491_vm4, %v488_v62, %v490_v1  ;;  %v493_v6 = vsel %vm491_vm4, %v490_v1, %v488_v62 }
  0xee   : > { %v496_v8 = vmul.f32 %v494_v63, %v492_v5  ;;  %v497_v9 = vmul.f32 %v495_v0, %v493_v6  ;;  %v770_v5 = vld [vmem:[%s1550_s5] sm:$0xf] }
  0xf0   : > { %v500_v10 = vrot.slane %v496_v8, 4  ;;  %v501_v11 = vrot.slane %v497_v9, 4 }
  0xf2   : > { %504 = vst [vmem:[#allocation2 + $0x8] sm:$0xf0] %v500_v10 }
  0xf3   : > { %505 = vst [vmem:[#allocation2 + $0x20] sm:$0xf0] %v501_v11 }
  0xf4   : > { %v355_v17 = vpop.permute.xlu0 %354  ;;  %v514_v18 = vpop.permute.xlu1 %513 }
  0xf5   : > { %v359_v19 = vsel %vm358_vm5, %v353_v13, %v355_v17  ;;  %v360_v20 = vsel %vm358_vm5, %v355_v17, %v353_v13  ;;  %v516_v26 = vsel %vm515_vm6, %v512_v2, %v514_v18  ;;  %v517_v27 = vsel %vm515_vm6, %v514_v18, %v512_v2 }
  0xf6   : > { %v363_v28 = vmul.f32 %v361_v12, %v360_v20  ;;  %v364_v29 = vmul.f32 %v362_v14, %v359_v19  ;;  %v520_v30 = vmul.f32 %v1380_v15, %v516_v26  ;;  %v521_v31 = vmul.f32 %v1382_v16, %v517_v27 }
  0xf8   : > { %365 = vst [vmem:[#allocation2 + $0x30] sm:$0xf] %v363_v28 }
  0xf9   : > { %366 = vst [vmem:[#allocation2] sm:$0xf] %v364_v29  ;;  %v531_v46 = vld [vmem:[#allocation2 + $0x8] sm:$0xff] }
  0xfa   : > { %522 = vst [vmem:[#allocation2 + $0x40] sm:$0xf] %v520_v30  ;;  %v532_v47 = vld [vmem:[#allocation2 + $0x20] sm:$0xff] }
  0xfb   : > { %523 = vst [vmem:[#allocation2 + $0x38] sm:$0xf] %v521_v31 }
  0xfc   : > { %v399_v35 = vpop.permute.xlu1 %398 }
  0xfd   : > { %v401_v38 = vsel %vm400_vm7, %v1324_v34, %v399_v35  ;;  %v402_v41 = vsel %vm400_vm7, %v399_v35, %v1324_v34  ;;  %v529_v34 = vld [vmem:[#allocation2 + $0x48] sm:$0xff] }
  0xfe   : > { %v405_v42 = vmul.f32 %v403_v32, %v402_v41  ;;  %v406_v43 = vmul.f32 %v404_v33, %v401_v38 }
  0xff   : > { %v525_v52 = vld [vmem:[#allocation2 + $0x30] sm:$0xff] }
 0x100   : > { %407 = vst [vmem:[#allocation2 + $0x18] sm:$0xf] %v405_v42  ;;  %v526_v53 = vld [vmem:[#allocation2] sm:$0xff] }
 0x101   : > { %408 = vst [vmem:[#allocation2 + $0x10] sm:$0xf] %v406_v43  ;;  %v533_v44 = vld [vmem:[#allocation2 + $0x40] sm:$0xf] }
 0x102   : > { %909 = vmatpush.msk.msra.mxu0 %vm539_vm8, %v533_v44  ;;  %v534_v45 = vld [vmem:[#allocation2 + $0x38] sm:$0xf] }
 0x103   : > { %911 = vmatpush.msk.msra.mxu1 %vm539_vm8, %v534_v45 }
 0x104   : > { %558 = vmatpush.msra.mxu0 %v531_v46  ;;  %v590_v56 = vpop.permute.xlu1 %589 }
 0x105   : > { %578 = vmatpush.msra.mxu1 %v532_v47 }
 0x106   : > { %559 = vmatpush.msra.mxu0 %v529_v34 }
 0x107   : > { %579 = vmatpush.msra.mxu1 %v530_v48  ;;  %v527_v49 = vld [vmem:[#allocation2 + $0x18] sm:$0xff] }
 0x108   : > { %560 = vmatpush.msra.mxu0 %v527_v49  ;;  %v528_v50 = vld [vmem:[#allocation2 + $0x10] sm:$0xff] }
 0x109   : > { %580 = vmatpush.msra.mxu1 %v528_v50 }
 0x10a   : > { %561 = vmatpush.msra.mxu0 %v525_v52 }
 0x10b   : > { %581 = vmatpush.msra.mxu1 %v526_v53  ;;  %910 = vmatmul.msk.f32.vlgmr.msra.gmra.mxu0 %vm535_vm9, %v524_v51 }
 0x10c   : > { %912 = vmatmul.msk.f32.vlgmr.msra.gmra.mxu1 %vm535_vm9, %v524_v51 }
 0x188   : > { %v563_v57 = vpop.f32.mrf.mxu0 }
 0x189   : > { %v583_v59 = vpop.f32.mrf.mxu1  ;;  %v592_v60 = vmul.f32 %v590_v56, %v563_v57 }
 0x18a   : > { %v593_v61 = vmul.f32 %v590_v56, %v583_v59 }
 0x18b   : > { %v600_v62 = vadd.f32 %v598_v58, %v592_v60 }
 0x18c   : > { %v601_v1 = vadd.f32 %v598_v58, %v593_v61 }
 0x18d   : > { %v602_v2 = vmax.f32 %v600_v62, 0.0 }
 0x18e   : > { %v603_v3 = vmax.f32 %v601_v1, 0.0 }
 0x18f   : > { %656 = vst [vmem:[#allocation2 + $0x48] sm:$0xf] %v602_v2  ;;  %700 = vrot.lane.b32.xlu2 %v602_v2, %s1139_s11  ;;  %684 = vrot.lane.b32.xlu0 %v602_v2, %s1137_s18 }
 0x190   : > { %657 = vst [vmem:[#allocation2 + $0x28] sm:$0xf] %v603_v3  ;;  %686 = vrot.lane.b32.xlu1 %v603_v3, %s1137_s18 }
 0x197   : > { %660 = vrot.lane.b32.xlu2 %v603_v3, %s1135_s16  ;;  %702 = vrot.lane.b32.xlu0 %v603_v3, %s1139_s11 }
 0x198   : > { %658 = vrot.lane.b32.xlu1 %v602_v2, %s1135_s16 }
 0x19f   : > { %640 = vrot.lane.b32.xlu2 %v602_v2, %s1134_s23  ;;  %674 = vrot.lane.b32.xlu0 %v602_v2, %s1136_s20 }
 0x1a0   : > { %676 = vrot.lane.b32.xlu1 %v603_v3, %s1136_s20 }
 0x1a7   : > { %616 = vrot.lane.b32.xlu2 %v603_v3, %s1132_s13  ;;  %642 = vrot.lane.b32.xlu0 %v603_v3, %s1134_s23  ;;  %s923_s23 = sshll.u32 %s1210_s12, 3  ;;  %s802_s12 = scalar_lea.sflag [#allocation5], %s1277_s25 }
 0x1a8   : > { %614 = vrot.lane.b32.xlu1 %v602_v2, %s1132_s13  ;;  %s813_s15 = scalar_lea.hbm %s1553_s8, %s923_s23 }
 0x1a9   : > { %s817_s9 = sshll.u32 %s813_s15, 4  ;;  %s818_s9 = int_to_ptr.hbm [resolvable:$true] %s817_s9 }
 0x1aa   : > { %s1071_s18 = sshra.s32 %s818_s9, 4  ;;  %s1072_s18 = int_to_ptr.hbm [resolvable:$true] %s1071_s18 }
 0x1ab   : > { %s1073_s16 = scalar_lea.hbm %s1072_s18, 8  ;;  %p1078_p12 = scmp.lt.s32.totalorder %s1072_s18, %s1553_s8 }
 0x1ac   : > { %p1074_p1 = scmp.ne.s32.totalorder %s1072_s18, %s1073_s16  ;;  %p1079_p8 = scmp.lt.s32.totalorder %s1077_s17, %s1073_s16 }
 0x1ae   : > { %p1075_p3 = pnand %p1074_p1, %p1246_p13  ;;  %p1080_p7 = por %p1079_p8, %p1078_p12 }
 0x1af   : > { %604 = vrot.lane.b32.xlu2 %v602_v2, %s1138_s21  ;;  %630 = vrot.lane.b32.xlu0 %v602_v2, %s1133_s22 }
 0x1b0   : > { %632 = vrot.lane.b32.xlu1 %v603_v3, %s1133_s22  ;;  %p1076_p5 = pneg %p1075_p3 }
 0x1b2   : > { %p1081_p9 = pnand %p1080_p7, %p1076_p5 }
 0x1b7   : > { %781 = vperm.xlu2 %993, %v778_v4   ;;  %606 = vrot.lane.b32.xlu0 %v603_v3, %s1138_s21 }
 0x1b8   : > { %773 = vperm.xlu1 %992, %v770_v5  }
 0x1e9   : > { %v701_v6 = vpop.permute.xlu2 %700 }
 0x1f1   : > { %v661_v17 = vpop.permute.xlu2 %660 }
 0x1f9   : > { %v641_v42 = vpop.permute.xlu2 %640 }
 0x201   : > { %v685_v7 = vpop.permute.xlu0 %684  ;;  %v617_v34 = vpop.permute.xlu2 %616 }
 0x202   : > { %v687_v8 = vpop.permute.xlu1 %686 }
 0x203   : > { %v688_v9 = vsel %vm491_vm4, %v685_v7, %v687_v8  ;;  %v689_v10 = vsel %vm491_vm4, %v687_v8, %v685_v7 }
 0x204   : > { %v690_v11 = vmul.f32 %v688_v9, %v494_v63  ;;  %v691_v13 = vmul.f32 %v689_v10, %v495_v0 }
 0x206   : > { %v694_v18 = vrot.slane %v690_v11, 4  ;;  %v695_v19 = vrot.slane %v691_v13, 4  ;;  %v710_v11 = vld [vmem:[%s1549_s4] sm:$0xf] }
 0x208   : > { %698 = vst [vmem:[#allocation2 + $0x8] sm:$0xf0] %v694_v18 }
 0x209   : > { %699 = vst [vmem:[#allocation2 + $0x20] sm:$0xf0] %v695_v19  ;;  %v703_v20 = vpop.permute.xlu0 %702  ;;  %v605_v5 = vpop.permute.xlu2 %604 }
 0x20a   : > { %v659_v26 = vpop.permute.xlu1 %658  ;;  %v704_v27 = vsel %vm515_vm6, %v701_v6, %v703_v20  ;;  %v705_v28 = vsel %vm515_vm6, %v703_v20, %v701_v6  ;;  %v787_v20 = vld.sshfl [vmem:[#allocation1] sm:$0xff pattern:$0x75316420] }
 0x20b   : > { %v662_v29 = vsel %vm449_vm2, %v659_v26, %v661_v17  ;;  %v663_v63 = vsel %vm449_vm2, %v661_v17, %v659_v26  ;;  %v706_v0 = vmul.f32 %v1380_v15, %v704_v27  ;;  %v707_v30 = vmul.f32 %v1382_v16, %v705_v28  ;;  %v788_v26 = vld.sshfl [vmem:[#allocation1 + $0x8] sm:$0xff pattern:$0x75316420] }
 0x20c   : > { %v664_v31 = vmul.f32 %v662_v29, %v452_v39  ;;  %v665_v35 = vmul.f32 %v663_v63, %v453_v40 }
 0x20d   : > { %708 = vst [vmem:[#allocation2 + $0x40] sm:$0xf] %v706_v0 }
 0x20e   : > { %v668_v38 = vrot.slane %v664_v31, 4  ;;  %v669_v41 = vrot.slane %v665_v35, 4  ;;  %709 = vst [vmem:[#allocation2 + $0x38] sm:$0xf] %v707_v30 }
 0x210   : > { %672 = vst [vmem:[#allocation2 + $0x48] sm:$0xf0] %v668_v38 }
 0x211   : > { %673 = vst [vmem:[#allocation2 + $0x28] sm:$0xf0] %v669_v41  ;;  %v675_v43 = vpop.permute.xlu0 %674  ;;  %v782_v17 = vpop.permute.xlu2 %781 }
 0x212   : > { %v677_v44 = vpop.permute.xlu1 %676 }
 0x213   : > { %v678_v15 = vsel %vm473_vm3, %v675_v43, %v677_v44  ;;  %v679_v16 = vsel %vm473_vm3, %v677_v44, %v675_v43 }
 0x214   : > { %v680_v39 = vmul.f32 %v678_v15, %v476_v54  ;;  %v681_v40 = vmul.f32 %v679_v16, %v477_v55  ;;  %v719_v45 = vld [vmem:[#allocation2 + $0x40] sm:$0xf] }
 0x215   : > { %913 = vmatpush.msk.msra.mxu2 %vm539_vm8, %v719_v45  ;;  %v720_v46 = vld [vmem:[#allocation2 + $0x38] sm:$0xf] }
 0x216   : > { %682 = vst [vmem:[#allocation2 + $0x8] sm:$0xf] %v680_v39  ;;  %915 = vmatpush.msk.msra.mxu3 %vm539_vm8, %v720_v46 }
 0x217   : > { %683 = vst [vmem:[#allocation2 + $0x20] sm:$0xf] %v681_v40  ;;  %v715_v1 = vld [vmem:[#allocation2 + $0x48] sm:$0xff] }
 0x219   : > { %v643_v47 = vpop.permute.xlu0 %642 }
 0x21a   : > { %v615_v48 = vpop.permute.xlu1 %614  ;;  %v644_v49 = vsel %vm418_vm1, %v641_v42, %v643_v47  ;;  %v645_v54 = vsel %vm418_vm1, %v643_v47, %v641_v42 }
 0x21b   : > { %v618_v55 = vsel %vm376_vm0, %v615_v48, %v617_v34  ;;  %v619_v50 = vsel %vm376_vm0, %v617_v34, %v615_v48  ;;  %v646_v51 = vmul.f32 %v645_v54, %v421_v36  ;;  %v647_v52 = vmul.f32 %v644_v49, %v422_v37  ;;  %v716_v36 = vld [vmem:[#allocation2 + $0x28] sm:$0xff] }
 0x21c   : > { %v620_v53 = vmul.f32 %v619_v50, %v379_v24  ;;  %v621_v56 = vmul.f32 %v618_v55, %v380_v25 }
 0x21d   : > { %v650_v57 = vrot.slane %v646_v51, 4  ;;  %v717_v58 = vld [vmem:[#allocation2 + $0x8] sm:$0xff]  ;;  %v651_v61 = vrot.slane %v647_v52, 4 }
 0x21e   : > { %v624_v59 = vrot.slane %v620_v53, 4  ;;  %v625_v60 = vrot.slane %v621_v56, 4  ;;  %742 = vmatpush.msra.mxu2 %v717_v58  ;;  %v718_v62 = vld [vmem:[#allocation2 + $0x20] sm:$0xff] }
 0x21f   : > { %654 = vst [vmem:[#allocation2 + $0x18] sm:$0xf0] %v650_v57  ;;  %762 = vmatpush.msra.mxu3 %v718_v62 }
 0x220   : > { %628 = vst [vmem:[#allocation2 + $0x30] sm:$0xf0] %v624_v59  ;;  %743 = vmatpush.msra.mxu2 %v715_v1 }
 0x221   : > { %629 = vst [vmem:[#allocation2] sm:$0xf0] %v625_v60  ;;  %763 = vmatpush.msra.mxu3 %v716_v36  ;;  %v631_v37 = vpop.permute.xlu0 %630 }
 0x222   : > { %655 = vst [vmem:[#allocation2 + $0x10] sm:$0xf0] %v651_v61  ;;  %v633_v24 = vpop.permute.xlu1 %632 }
 0x223   : > { %v634_v25 = vsel %vm400_vm7, %v631_v37, %v633_v24  ;;  %v635_v2 = vsel %vm400_vm7, %v633_v24, %v631_v37 }
 0x224   : > { %v636_v3 = vmul.f32 %v635_v2, %v403_v32  ;;  %v637_v4 = vmul.f32 %v634_v25, %v404_v33 }
 0x226   : > { %638 = vst [vmem:[#allocation2 + $0x18] sm:$0xf] %v636_v3 }
 0x227   : > { %639 = vst [vmem:[#allocation2 + $0x10] sm:$0xf] %v637_v4 }
 0x229   : > { %v607_v6 = vpop.permute.xlu0 %606 }
 0x22a   : > { %v608_v7 = vsel %vm358_vm5, %v605_v5, %v607_v6  ;;  %v609_v8 = vsel %vm358_vm5, %v607_v6, %v605_v5  ;;  %v774_v22 = vpop.permute.xlu1 %773 }
 0x22b   : > { %v610_v9 = vmul.f32 %v609_v8, %v361_v12  ;;  %v611_v10 = vmul.f32 %v608_v7, %v362_v14 }
 0x22d   : > { %612 = vst [vmem:[#allocation2 + $0x30] sm:$0xf] %v610_v9  ;;  %v713_v32 = vld [vmem:[#allocation2 + $0x18] sm:$0xff] }
 0x22e   : > { %613 = vst [vmem:[#allocation2] sm:$0xf] %v611_v10  ;;  %744 = vmatpush.msra.mxu2 %v713_v32  ;;  %v714_v33 = vld [vmem:[#allocation2 + $0x10] sm:$0xff] }
 0x22f   : > { %764 = vmatpush.msra.mxu3 %v714_v33 }
 0x234   : > { %v711_v13 = vld [vmem:[#allocation2 + $0x30] sm:$0xff] }
 0x235   : > { %745 = vmatpush.msra.mxu2 %v711_v13  ;;  %v712_v21 = vld [vmem:[#allocation2] sm:$0xff] }
 0x236   : > { %765 = vmatpush.msra.mxu3 %v712_v21  ;;  %914 = vmatmul.msk.f32.vlgmr.msra.gmra.mxu2 %vm535_vm9, %v710_v11 }
 0x237   : > { %916 = vmatmul.msk.f32.vlgmr.msra.gmra.mxu3 %vm535_vm9, %v710_v11 }
 0x2b9   : > { %v747_v23 = vpop.f32.mrf.mxu2 }
 0x2ba   : > { %v776_v12 = vmul.f32 %v774_v22, %v747_v23  ;;  %v767_v14 = vpop.f32.mrf.mxu3 }
 0x2bb   : > { %v777_v18 = vmul.f32 %v774_v22, %v767_v14 }
 0x2bc   : > { %v784_v19 = vadd.f32 %v782_v17, %v776_v12 }
 0x2bd   : > { %v785_v27 = vadd.f32 %v782_v17, %v777_v18 }
 0x2be   : > { %v791_v28 = vadd.f32 %v787_v20, %v784_v19 }
 0x2bf   : > { %v792_v29 = vadd.f32 %v788_v26, %v785_v27 }
 0x2c0   : > { %v793_v0 = vmax.f32 %v791_v28, 0.0 }
 0x2c1   : > { %v794_v63 = vmax.f32 %v792_v29, 0.0 }
 0x2c3   : > { %v797_v30 = vrot.slane %v794_v63, 4 }
 0x2c5   : > { %v798_v31 = vsel %vm539_vm8, %v793_v0, %v797_v30 }
 0x2c6   : > { %800 = vst [vmem:[%s340_s10] sm:$0xff] %v798_v31 }
 0x2c7   : > { %1084 = shalt.err (!%p1081_p9)
}
 0x2c8   : > { %930 = dma.vmem_to_hbm [thread:$0]  (%p1246_p13), %s816_s7, 128, %s818_s9, %s802_s12  }
 0x2c9 PF: > { %s829_s25 = sand.u32 1, %s1115_s27   ;;  %p1562_p10 = scmp.ge.s32.totalorder %s1127_s30, 2 }
 0x2ca   : > { %s830_s23 = scalar_lea.sflag [#allocation5], %s829_s25 }
 0x2cb   : > { %p941_p11 = pnand %p1562_p10, %p1251_p4 }
 0x2cd   : > { %p942_p0 = pneg %p941_p11 }
 0x2cf   : > { %1110 = dma.done.wait (%p942_p0), %s830_s23, 128  }
 0x2d0   : > { %1112 = vsyncadd (%p942_p0), %s830_s23, 4294967168  ;;  %s1563_s20 = sld [smem:[#allocation12_spill]]  ;;  %p22_p2 = scmp.ge.s32.totalorder %s1226_s19, 4  }
 0x2d1   : > { %s1564_s27 = smov %s1119_s28  ;;  %s1565_s28 = smov %s1123_s29 }
 0x2d2   : > { %s1567_s30 = smov %s1226_s19  ;;  %24 = sbr.rel (!%p22_p2) target bundleno = 8 (0x8), region = 101 }
 0x2d6   : > { %s1566_s29 = smov %s1563_s20 }
 0x2d7   :  { %836 = vsyncpa [#allocation4], 1 }
 0x2d8   :  { %838 = vsyncpa [#allocation4 + $0x1], 1 }
 0x2d9   :  { %839 = vsyncpa [#allocation7], 1 }
 0x2da   :  { %840 = vsyncpa [#allocation5], 1 }
 0x2db   :  { %842 = vsyncpa [#allocation5 + $0x1], 1 }

</bundles_post_ra>
